<compile_context>
chip_gen: v7x
topology: tpu7x:2x2x1
jax: 0.10.0
libtpu: 0.0.40
codegen_flags: <defaults>
</compile_context>

<pallas_src>
import jax
import jax.numpy as jnp
from jax.experimental import pallas as pl
from jax.experimental.pallas import tpu as pltpu


def _round_up(x, m):
    return (x + m - 1) // m * m


# ------------------------------ fused kernel -------------------------------

def _make_tcn_kernel(layer_meta, kernel_size, cp, cout_p, r_pad, t_rows,
                     num_w, compute_dtype):
    """layer_meta: tuple of (dilation, has_res_matmul) per TemporalBlock."""
    win = r_pad + t_rows
    K = kernel_size

    def kernel(x_ref, halo_ref, *rest):
        w_refs = rest[:num_w]
        o_ref = rest[num_w]
        win_buf = rest[num_w + 1]          # (win, cin_p) compute_dtype scratch
        zbuf = rest[num_w + 2]             # (win, cp) f32 scratch for shifts

        tile = pl.program_id(1)
        t_base = tile * t_rows

        # Assemble the (halo ++ tile) input window with sublane-aligned stores.
        win_buf[pl.ds(0, r_pad), :] = halo_ref[...]
        win_buf[pl.ds(r_pad, t_rows), :] = x_ref[...]

        # Window-row index, hoisted once for all layers/taps.
        row = jax.lax.broadcasted_iota(jnp.int32, (win, 1), 0)

        def causal_conv(inp_cd, wcat, b, dilation, has_res):
            # Fused K-tap (+ optional residual) channel mix on the MXU.
            z = jnp.dot(inp_cd, wcat, preferred_element_type=jnp.float32)
            acc = z[:, (K - 1) * cp:K * cp]          # tap with zero time offset
            for k in range(K - 1):
                off = (K - 1 - k) * dilation
                zk = z[:, k * cp:(k + 1) * cp]
                if off % 8 == 0:
                    # Sublane-aligned shift through VMEM (vld/vst slots)
                    # instead of pltpu.roll on the contended extended slot.
                    zbuf[pl.ds(off, win - off), :] = zk[:win - off, :]
                    shifted = zbuf[...]
                else:
                    shifted = pltpu.roll(zk, shift=off, axis=0)
                # Zero contributions whose source global time < 0 (causal left
                # pad); for tiles past the start this mask is all-true.
                thresh = r_pad + off - t_base
                acc = acc + jnp.where(row >= thresh, shifted, 0.0)
            acc = acc + b                             # bias once per conv, f32
            res = z[:, K * cp:(K + 1) * cp] if has_res else None
            return acc, res

        h32 = None
        idx = 0
        for li, (dilation, has_res) in enumerate(layer_meta):  # static unroll
            w1 = w_refs[idx][...]
            b1 = w_refs[idx + 1][...]
            w2 = w_refs[idx + 2][...]
            b2 = w_refs[idx + 3][...]
            idx += 4
            bd = None
            if has_res:
                bd = w_refs[idx][...]
                idx += 1

            inp_cd = win_buf[...] if li == 0 else h32.astype(compute_dtype)
            a1_pre, res = causal_conv(inp_cd, w1, b1, dilation, has_res)
            a1 = jnp.maximum(a1_pre, 0.0)
            # dropout1: identity at inference
            a2_pre, _ = causal_conv(a1.astype(compute_dtype), w2, b2,
                                    dilation, False)
            a2 = jnp.maximum(a2_pre, 0.0)
            # dropout2: identity at inference
            if has_res:
                res = res + bd                        # fused downsample / identity
            else:
                res = h32                             # same channel count: res = x
            h32 = jnp.maximum(a2 + res, 0.0)          # residual + final ReLU, f32

        # Store only the real (non-halo) rows and only the real output lanes.
        o_ref[...] = h32[r_pad:, :cout_p].astype(o_ref.dtype)

    return kernel


# --------------------------------- wrapper ----------------------------------

def temporal_conv_net_pallas(x_ncl, all_params, kernel_size=2,
                             compute_dtype=jnp.bfloat16, time_tile=512):
    """Full TCN forward. Input/output in PyTorch NCL layout."""
    n, c_in, ell = x_ncl.shape
    K = kernel_size
    num_layers = len(all_params)
    c_out_last = all_params[-1]["w1"].shape[0]
    max_c = max(p["w1"].shape[0] for p in all_params)
    cp = _round_up(max(max_c, 128), 128)      # lane-dense internal channel pad
    cin_p = _round_up(c_in, 8)                # narrow HBM input (sublane pad only)
    cout_p = _round_up(c_out_last, 8)         # narrow HBM output

    # Receptive field (history) of the whole stack: 2 convs per layer.
    recf = 2 * (K - 1) * (2 ** num_layers - 1)
    align = 16                                # sublane-aligned even for packed bf16
    r_pad = max(_round_up(max(recf, 1), align), align)
    t_rows = min(time_tile, _round_up(ell, align))
    t_rows = _round_up(max(t_rows, r_pad), align)
    num_tiles = (ell + t_rows - 1) // t_rows
    lp = num_tiles * t_rows
    win = r_pad + t_rows

    def pad_w(w_t, rows):                     # w_t: (in_ch, out_ch)
        r, c = w_t.shape
        return jnp.pad(w_t, ((0, rows - r), (0, cp - c)))

    def pad_b(b):
        return jnp.pad(b, (0, cp - b.shape[0])).reshape(1, cp).astype(jnp.float32)

    layer_meta = []
    weight_arrays = []
    for i, p in enumerate(all_params):
        dilation = 2 ** i
        in_ch = p["w1"].shape[1]
        rows = cin_p if i == 0 else cp
        has_ds = "wd" in p
        # Layer 0 always carries a residual column block (real downsample or a
        # padded identity) so the narrow input only ever feeds matmuls.
        has_res = has_ds or (i == 0)
        layer_meta.append((dilation, has_res))

        taps = [pad_w(p["w1"][:, :, k].T, rows) for k in range(K)]
        if has_res:
            if has_ds:
                res_w = pad_w(p["wd"][:, :, 0].T, rows)
                res_b = pad_b(p["bd"])
            else:                             # identity residual (layer 0, in==out)
                res_w = pad_w(jnp.eye(in_ch, dtype=jnp.float32), rows)
                res_b = jnp.zeros((1, cp), jnp.float32)
            taps = taps + [res_w]
        w1cat = jnp.concatenate(taps, axis=1).astype(compute_dtype)
        w2cat = jnp.concatenate(
            [pad_w(p["w2"][:, :, k].T, cp) for k in range(K)],
            axis=1).astype(compute_dtype)
        weight_arrays += [w1cat, pad_b(p["b1"]), w2cat, pad_b(p["b2"])]
        if has_res:
            weight_arrays += [res_b]

    # NCL -> NLC; pad channels only to a multiple of 8 and time to the tile grid.
    x_nlc = jnp.transpose(x_ncl, (0, 2, 1))
    x_p = jnp.pad(x_nlc, ((0, 0), (0, lp - ell), (0, cin_p - c_in)))
    x_p = x_p.astype(compute_dtype)
    x_tiles = x_p.reshape(n, num_tiles, t_rows, cin_p)
    # Halo for tile t = last r_pad rows of tile t-1 (zeros for tile 0).
    halo = jnp.concatenate(
        [jnp.zeros((n, 1, r_pad, cin_p), compute_dtype),
         x_tiles[:, :-1, t_rows - r_pad:, :]], axis=1)
    halo = halo.reshape(n, num_tiles * r_pad, cin_p)

    kernel = _make_tcn_kernel(tuple(layer_meta), K, cp, cout_p, r_pad, t_rows,
                              len(weight_arrays), compute_dtype)

    x_spec = pl.BlockSpec((None, t_rows, cin_p), lambda b, t: (b, t, 0))
    halo_spec = pl.BlockSpec((None, r_pad, cin_p), lambda b, t: (b, t, 0))
    out_spec = pl.BlockSpec((None, t_rows, cout_p), lambda b, t: (b, t, 0))
    # Weights: full-array VMEM blocks, constant index_maps -> fetched once.
    w_specs = [pl.BlockSpec(w.shape, lambda b, t: (0, 0)) for w in weight_arrays]

    # Advisory cost for XLA's scheduler around the custom call.
    flops = 0
    for i, (dilation, has_res) in enumerate(layer_meta):
        rows = cin_p if i == 0 else cp
        flops += 2 * rows * (K + int(has_res)) * cp      # conv1 (+ fused residual)
        flops += 2 * cp * K * cp                         # conv2
    flops *= n * num_tiles * win
    bytes_io = (int(x_p.size) * x_p.dtype.itemsize
                + int(halo.size) * halo.dtype.itemsize
                + n * lp * cout_p * x_ncl.dtype.itemsize
                + sum(int(w.size) * w.dtype.itemsize for w in weight_arrays))
    cost = pl.CostEstimate(flops=int(flops), transcendentals=0,
                           bytes_accessed=int(bytes_io))

    out = pl.pallas_call(
        kernel,
        out_shape=jax.ShapeDtypeStruct((n, lp, cout_p), x_ncl.dtype),
        grid=(n, num_tiles),
        in_specs=[x_spec, halo_spec] + w_specs,
        out_specs=out_spec,
        scratch_shapes=[pltpu.VMEM((win, cin_p), compute_dtype),
                        pltpu.VMEM((win, cp), jnp.float32)],
        compiler_params=pltpu.CompilerParams(
            # Halo recompute makes time tiles independent -> both axes parallel
            # (keeps a v7x TensorCore busy even at batch=1).
            dimension_semantics=("parallel", "parallel"),
            # Raise the scoped VMEM budget above the 16/32 MiB defaults while
            # staying below v7x's 64 MiB physical (use ~96-110 MiB on v5e/v6e
            # only if much larger time tiles are desired).
            vmem_limit_bytes=48 * 1024 * 1024),
        cost_estimate=cost,
    )(x_p, halo, *weight_arrays)

    # Strip time padding / padded lanes, NLC -> NCL.
    return jnp.transpose(out[:, :ell, :c_out_last], (0, 2, 1))


# ----------------------------- parameter init ------------------------------

def init_tcn_params(key, num_inputs, num_channels, kernel_size=2):
    all_params = []
    for i, out_ch in enumerate(num_channels):
        in_ch = num_inputs if i == 0 else num_channels[i - 1]
        key, k1, k2, k3, k4, k5, k6 = jax.random.split(key, 7)
        p = {
            # init_weights(): normal(0, 0.01) on conv weights
            "w1": 0.01 * jax.random.normal(k1, (out_ch, in_ch, kernel_size),
                                           jnp.float32),
            "b1": 0.05 * jax.random.normal(k2, (out_ch,), jnp.float32),
            "w2": 0.01 * jax.random.normal(k3, (out_ch, out_ch, kernel_size),
                                           jnp.float32),
            "b2": 0.05 * jax.random.normal(k4, (out_ch,), jnp.float32),
        }
        if in_ch != out_ch:
            p["wd"] = 0.01 * jax.random.normal(k5, (out_ch, in_ch, 1),
                                               jnp.float32)
            p["bd"] = 0.05 * jax.random.normal(k6, (out_ch,), jnp.float32)
        all_params.append(p)
    return all_params


# ------------------------- pure-JAX reference (NCL) -------------------------

def _ref_block(x_ncl, p, dilation, kernel_size=2):
    pad = (kernel_size - 1) * dilation

    def conv(inp, w, b):
        y = jax.lax.conv_general_dilated(
            inp, w, window_strides=(1,), padding=[(pad, pad)],
            rhs_dilation=(dilation,), dimension_numbers=("NCH", "OIH", "NCH"))
        return y + b[None, :, None]

    out = jnp.maximum(conv(x_ncl, p["w1"], p["b1"])[:, :, :-pad], 0.0)
    out = jnp.maximum(conv(out, p["w2"], p["b2"])[:, :, :-pad], 0.0)
    if "wd" in p:
        res = jnp.einsum("oc,ncl->nol", p["wd"][:, :, 0], x_ncl) \
            + p["bd"][None, :, None]
    else:
        res = x_ncl
    return jnp.maximum(out + res, 0.0)


def ref_tcn(x_ncl, all_params, kernel_size=2):
    x = x_ncl
    for i, p in enumerate(all_params):
        x = _ref_block(x, p, 2 ** i, kernel_size)
    return x


# ---------------------------------- main ------------------------------------

if __name__ == "__main__":
    key = jax.random.PRNGKey(0)

    def check(name, num_inputs, num_channels, seq_len, batch, time_tile, k):
        kx, kp = jax.random.split(k)
        x = jax.random.normal(kx, (batch, num_inputs, seq_len), jnp.float32)
        params = init_tcn_params(kp, num_inputs, num_channels, kernel_size=2)
        y_ref = jax.block_until_ready(ref_tcn(x, params, 2))

        # f32 compute: tight check against the pure-JAX reference.
        y32 = jax.block_until_ready(temporal_conv_net_pallas(
            x, params, 2, compute_dtype=jnp.float32, time_tile=time_tile))
        assert y32.shape == (batch, num_channels[-1], seq_len), (name, y32.shape)
        err32 = float(jnp.max(jnp.abs(y32 - y_ref)))
        assert err32 < 1e-3, f"{name}: f32 mismatch vs reference: {err32}"

        # bf16 matmul operands + f32 accumulation (default, recommended config).
        ybf = jax.block_until_ready(temporal_conv_net_pallas(
            x, params, 2, compute_dtype=jnp.bfloat16, time_tile=time_tile))
        errbf = float(jnp.max(jnp.abs(ybf - y_ref)))
        assert errbf < 5e-2, f"{name}: bf16 mismatch vs reference: {errbf}"

    k1, k2 = jax.random.split(key)
    # Small config: batch=2, num_inputs=4, seq=16, channels (8, 8) (single tile,
    # real downsample on layer 0).
    check("small", 4, (8, 8), 16, 2, 512, k1)
    # Deeper multi-tile config: 4 layers (dilations 1,2,4,8), seq=70 not a
    # multiple of the tile, identity-residual fusion on layer 0, mid-stack
    # downsample, and the aligned-slice (non-roll) shift path for dilation 8.
    check("tiled", 8, (8, 16, 16, 16), 70, 2, 32, k2)

    print("KERNEL_OK")
</pallas_src>

<mosaic_0001>
module attributes {stable_mosaic.version = 11 : i64} {
  func.func @kernel(%arg0: i32, %arg1: i32, %arg2: memref<1x16x8xf32, #tpu.memory_space<vmem>>, %arg3: memref<1x16x8xf32, #tpu.memory_space<vmem>>, %arg4: memref<8x384xf32, #tpu.memory_space<vmem>>, %arg5: memref<1x128xf32, #tpu.memory_space<vmem>>, %arg6: memref<128x256xf32, #tpu.memory_space<vmem>>, %arg7: memref<1x128xf32, #tpu.memory_space<vmem>>, %arg8: memref<1x128xf32, #tpu.memory_space<vmem>>, %arg9: memref<128x256xf32, #tpu.memory_space<vmem>>, %arg10: memref<1x128xf32, #tpu.memory_space<vmem>>, %arg11: memref<128x256xf32, #tpu.memory_space<vmem>>, %arg12: memref<1x128xf32, #tpu.memory_space<vmem>>, %arg13: memref<1x16x8xf32, #tpu.memory_space<vmem>>, %arg14: memref<32x8xf32, #tpu.memory_space<vmem>>, %arg15: memref<32x128xf32, #tpu.memory_space<vmem>>) attributes {dimension_semantics = [#tpu.dimension_semantics<parallel>, #tpu.dimension_semantics<parallel>], iteration_bounds = array<i64: 2, 1>, scalar_prefetch = 0 : i64, scratch_operands = 2 : i64, tpu.core_type = #tpu.core_type<tc>, window_params = [{transform_indices = @transform_0, window_bounds = array<i64: 1, 16, 8>}, {transform_indices = @transform_1, window_bounds = array<i64: 1, 16, 8>}, {pipeline_mode = #tpu.pipeline_mode<synchronous>, transform_indices = @transform_2, window_bounds = array<i64: 8, 384>}, {pipeline_mode = #tpu.pipeline_mode<synchronous>, transform_indices = @transform_3, window_bounds = array<i64: 1, 128>}, {pipeline_mode = #tpu.pipeline_mode<synchronous>, transform_indices = @transform_4, window_bounds = array<i64: 128, 256>}, {pipeline_mode = #tpu.pipeline_mode<synchronous>, transform_indices = @transform_5, window_bounds = array<i64: 1, 128>}, {pipeline_mode = #tpu.pipeline_mode<synchronous>, transform_indices = @transform_6, window_bounds = array<i64: 1, 128>}, {pipeline_mode = #tpu.pipeline_mode<synchronous>, transform_indices = @transform_7, window_bounds = array<i64: 128, 256>}, {pipeline_mode = #tpu.pipeline_mode<synchronous>, transform_indices = @transform_8, window_bounds = array<i64: 1, 128>}, {pipeline_mode = #tpu.pipeline_mode<synchronous>, transform_indices = @transform_9, window_bounds = array<i64: 128, 256>}, {pipeline_mode = #tpu.pipeline_mode<synchronous>, transform_indices = @transform_10, window_bounds = array<i64: 1, 128>}, {transform_indices = @transform_11, window_bounds = array<i64: 1, 16, 8>}]} {
    %c16_i32 = arith.constant 16 : i32
    %0 = arith.muli %arg1, %c16_i32 : i32
    %c0 = arith.constant 0 : index
    %c0_0 = arith.constant 0 : index
    %c0_1 = arith.constant 0 : index
    %1 = vector.load %arg3[%c0, %c0_0, %c0_1] : memref<1x16x8xf32, #tpu.memory_space<vmem>>, vector<1x16x8xf32>
    %2 = vector.shape_cast %1 : vector<1x16x8xf32> to vector<16x8xf32>
    %c0_2 = arith.constant 0 : index
    %c0_3 = arith.constant 0 : index
    %3 = vector.load %arg14[%c0_2, %c0_3] : memref<32x8xf32, #tpu.memory_space<vmem>>, vector<16x8xf32>
    tpu.vector_store %arg14[%c0_2, %c0_3], %2 {strides = array<i32>} : memref<32x8xf32, #tpu.memory_space<vmem>>, vector<16x8xf32>,
    %c0_4 = arith.constant 0 : index
    %c0_5 = arith.constant 0 : index
    %c0_6 = arith.constant 0 : index
    %4 = vector.load %arg2[%c0_4, %c0_5, %c0_6] : memref<1x16x8xf32, #tpu.memory_space<vmem>>, vector<1x16x8xf32>
    %5 = vector.shape_cast %4 : vector<1x16x8xf32> to vector<16x8xf32>
    %c16 = arith.constant 16 : index
    %c0_7 = arith.constant 0 : index
    %6 = vector.load %arg14[%c16, %c0_7] : memref<32x8xf32, #tpu.memory_space<vmem>>, vector<16x8xf32>
    tpu.vector_store %arg14[%c16, %c0_7], %5 {strides = array<i32>} : memref<32x8xf32, #tpu.memory_space<vmem>>, vector<16x8xf32>,
    %7 = tpu.iota {dimensions = array<i32: 0>} : vector<32x1xi32>
    %c0_8 = arith.constant 0 : index
    %c0_9 = arith.constant 0 : index
    %8 = vector.load %arg4[%c0_8, %c0_9] : memref<8x384xf32, #tpu.memory_space<vmem>>, vector<8x384xf32>
    %c0_10 = arith.constant 0 : index
    %c0_11 = arith.constant 0 : index
    %9 = vector.load %arg5[%c0_10, %c0_11] : memref<1x128xf32, #tpu.memory_space<vmem>>, vector<1x128xf32>
    %c0_12 = arith.constant 0 : index
    %c0_13 = arith.constant 0 : index
    %10 = vector.load %arg6[%c0_12, %c0_13] : memref<128x256xf32, #tpu.memory_space<vmem>>, vector<128x256xf32>
    %c0_14 = arith.constant 0 : index
    %c0_15 = arith.constant 0 : index
    %11 = vector.load %arg7[%c0_14, %c0_15] : memref<1x128xf32, #tpu.memory_space<vmem>>, vector<1x128xf32>
    %c0_16 = arith.constant 0 : index
    %c0_17 = arith.constant 0 : index
    %12 = vector.load %arg8[%c0_16, %c0_17] : memref<1x128xf32, #tpu.memory_space<vmem>>, vector<1x128xf32>
    %c0_18 = arith.constant 0 : index
    %c0_19 = arith.constant 0 : index
    %13 = vector.load %arg14[%c0_18, %c0_19] : memref<32x8xf32, #tpu.memory_space<vmem>>, vector<32x8xf32>
    %cst = arith.constant dense<0.000000e+00> : vector<32x384xf32>
    %14 = tpu.matmul %13, %8, %cst {dimension_numbers = #tpu.dot_dimension_numbers<[1], [0], [0], [1], [0, 0, 1, 1], [], []>} : vector<32x8xf32>, vector<8x384xf32>, vector<32x384xf32> -> vector<32x384xf32>
    %15 = vector.extract_strided_slice %14 {offsets = [0, 128], sizes = [32, 128], strides = [1, 1]} : vector<32x384xf32> to vector<32x128xf32>
    %16 = vector.extract_strided_slice %14 {offsets = [0, 0], sizes = [32, 128], strides = [1, 1]} : vector<32x384xf32> to vector<32x128xf32>
    %c1_i32 = arith.constant 1 : i32
    %17 = tpu.dynamic_rotate %16 by %c1_i32 dim 0 : vector<32x128xf32>, i32 -> vector<32x128xf32>
    %c17_i32 = arith.constant 17 : i32
    %18 = arith.subi %c17_i32, %0 : i32
    %19 = vector.broadcast %18 : i32 to vector<32x1xi32>
    %20 = arith.cmpi sge, %7, %19 : vector<32x1xi32>
    %cst_20 = arith.constant 0.000000e+00 : f32
    %21 = vector.shape_cast %20 : vector<32x1xi1> to vector<32x1xi1>
    %22 = vector.broadcast %21 : vector<32x1xi1> to vector<32x128xi1>
    %23 = vector.broadcast %cst_20 : f32 to vector<32x128xf32>
    %24 = arith.select %22, %17, %23 : vector<32x128xi1>, vector<32x128xf32>
    %25 = arith.addf %15, %24 : vector<32x128xf32>
    %26 = vector.broadcast %9 : vector<1x128xf32> to vector<32x128xf32>
    %27 = arith.addf %25, %26 : vector<32x128xf32>
    %28 = vector.extract_strided_slice %14 {offsets = [0, 256], sizes = [32, 128], strides = [1, 1]} : vector<32x384xf32> to vector<32x128xf32>
    %cst_21 = arith.constant 0.000000e+00 : f32
    %29 = vector.broadcast %cst_21 : f32 to vector<32x128xf32>
    %30 = arith.maximumf %27, %29 : vector<32x128xf32>
    %cst_22 = arith.constant dense<0.000000e+00> : vector<32x256xf32>
    %31 = tpu.matmul %30, %10, %cst_22 {dimension_numbers = #tpu.dot_dimension_numbers<[1], [0], [0], [1], [0, 0, 1, 1], [], []>} : vector<32x128xf32>, vector<128x256xf32>, vector<32x256xf32> -> vector<32x256xf32>
    %32 = vector.extract_strided_slice %31 {offsets = [0, 128], sizes = [32, 128], strides = [1, 1]} : vector<32x256xf32> to vector<32x128xf32>
    %33 = vector.extract_strided_slice %31 {offsets = [0, 0], sizes = [32, 128], strides = [1, 1]} : vector<32x256xf32> to vector<32x128xf32>
    %c1_i32_23 = arith.constant 1 : i32
    %34 = tpu.dynamic_rotate %33 by %c1_i32_23 dim 0 : vector<32x128xf32>, i32 -> vector<32x128xf32>
    %c17_i32_24 = arith.constant 17 : i32
    %35 = arith.subi %c17_i32_24, %0 : i32
    %36 = vector.broadcast %35 : i32 to vector<32x1xi32>
    %37 = arith.cmpi sge, %7, %36 : vector<32x1xi32>
    %cst_25 = arith.constant 0.000000e+00 : f32
    %38 = vector.shape_cast %37 : vector<32x1xi1> to vector<32x1xi1>
    %39 = vector.broadcast %38 : vector<32x1xi1> to vector<32x128xi1>
    %40 = vector.broadcast %cst_25 : f32 to vector<32x128xf32>
    %41 = arith.select %39, %34, %40 : vector<32x128xi1>, vector<32x128xf32>
    %42 = arith.addf %32, %41 : vector<32x128xf32>
    %43 = vector.broadcast %11 : vector<1x128xf32> to vector<32x128xf32>
    %44 = arith.addf %42, %43 : vector<32x128xf32>
    %cst_26 = arith.constant 0.000000e+00 : f32
    %45 = vector.broadcast %cst_26 : f32 to vector<32x128xf32>
    %46 = arith.maximumf %44, %45 : vector<32x128xf32>
    %47 = vector.broadcast %12 : vector<1x128xf32> to vector<32x128xf32>
    %48 = arith.addf %28, %47 : vector<32x128xf32>
    %49 = arith.addf %46, %48 : vector<32x128xf32>
    %cst_27 = arith.constant 0.000000e+00 : f32
    %50 = vector.broadcast %cst_27 : f32 to vector<32x128xf32>
    %51 = arith.maximumf %49, %50 : vector<32x128xf32>
    %c0_28 = arith.constant 0 : index
    %c0_29 = arith.constant 0 : index
    %52 = vector.load %arg9[%c0_28, %c0_29] : memref<128x256xf32, #tpu.memory_space<vmem>>, vector<128x256xf32>
    %c0_30 = arith.constant 0 : index
    %c0_31 = arith.constant 0 : index
    %53 = vector.load %arg10[%c0_30, %c0_31] : memref<1x128xf32, #tpu.memory_space<vmem>>, vector<1x128xf32>
    %c0_32 = arith.constant 0 : index
    %c0_33 = arith.constant 0 : index
    %54 = vector.load %arg11[%c0_32, %c0_33] : memref<128x256xf32, #tpu.memory_space<vmem>>, vector<128x256xf32>
    %c0_34 = arith.constant 0 : index
    %c0_35 = arith.constant 0 : index
    %55 = vector.load %arg12[%c0_34, %c0_35] : memref<1x128xf32, #tpu.memory_space<vmem>>, vector<1x128xf32>
    %cst_36 = arith.constant dense<0.000000e+00> : vector<32x256xf32>
    %56 = tpu.matmul %51, %52, %cst_36 {dimension_numbers = #tpu.dot_dimension_numbers<[1], [0], [0], [1], [0, 0, 1, 1], [], []>} : vector<32x128xf32>, vector<128x256xf32>, vector<32x256xf32> -> vector<32x256xf32>
    %57 = vector.extract_strided_slice %56 {offsets = [0, 128], sizes = [32, 128], strides = [1, 1]} : vector<32x256xf32> to vector<32x128xf32>
    %58 = vector.extract_strided_slice %56 {offsets = [0, 0], sizes = [32, 128], strides = [1, 1]} : vector<32x256xf32> to vector<32x128xf32>
    %c2_i32 = arith.constant 2 : i32
    %59 = tpu.dynamic_rotate %58 by %c2_i32 dim 0 : vector<32x128xf32>, i32 -> vector<32x128xf32>
    %c18_i32 = arith.constant 18 : i32
    %60 = arith.subi %c18_i32, %0 : i32
    %61 = vector.broadcast %60 : i32 to vector<32x1xi32>
    %62 = arith.cmpi sge, %7, %61 : vector<32x1xi32>
    %cst_37 = arith.constant 0.000000e+00 : f32
    %63 = vector.shape_cast %62 : vector<32x1xi1> to vector<32x1xi1>
    %64 = vector.broadcast %63 : vector<32x1xi1> to vector<32x128xi1>
    %65 = vector.broadcast %cst_37 : f32 to vector<32x128xf32>
    %66 = arith.select %64, %59, %65 : vector<32x128xi1>, vector<32x128xf32>
    %67 = arith.addf %57, %66 : vector<32x128xf32>
    %68 = vector.broadcast %53 : vector<1x128xf32> to vector<32x128xf32>
    %69 = arith.addf %67, %68 : vector<32x128xf32>
    %cst_38 = arith.constant 0.000000e+00 : f32
    %70 = vector.broadcast %cst_38 : f32 to vector<32x128xf32>
    %71 = arith.maximumf %69, %70 : vector<32x128xf32>
    %cst_39 = arith.constant dense<0.000000e+00> : vector<32x256xf32>
    %72 = tpu.matmul %71, %54, %cst_39 {dimension_numbers = #tpu.dot_dimension_numbers<[1], [0], [0], [1], [0, 0, 1, 1], [], []>} : vector<32x128xf32>, vector<128x256xf32>, vector<32x256xf32> -> vector<32x256xf32>
    %73 = vector.extract_strided_slice %72 {offsets = [0, 128], sizes = [32, 128], strides = [1, 1]} : vector<32x256xf32> to vector<32x128xf32>
    %74 = vector.extract_strided_slice %72 {offsets = [0, 0], sizes = [32, 128], strides = [1, 1]} : vector<32x256xf32> to vector<32x128xf32>
    %c2_i32_40 = arith.constant 2 : i32
    %75 = tpu.dynamic_rotate %74 by %c2_i32_40 dim 0 : vector<32x128xf32>, i32 -> vector<32x128xf32>
    %c18_i32_41 = arith.constant 18 : i32
    %76 = arith.subi %c18_i32_41, %0 : i32
    %77 = vector.broadcast %76 : i32 to vector<32x1xi32>
    %78 = arith.cmpi sge, %7, %77 : vector<32x1xi32>
    %cst_42 = arith.constant 0.000000e+00 : f32
    %79 = vector.shape_cast %78 : vector<32x1xi1> to vector<32x1xi1>
    %80 = vector.broadcast %79 : vector<32x1xi1> to vector<32x128xi1>
    %81 = vector.broadcast %cst_42 : f32 to vector<32x128xf32>
    %82 = arith.select %80, %75, %81 : vector<32x128xi1>, vector<32x128xf32>
    %83 = arith.addf %73, %82 : vector<32x128xf32>
    %84 = vector.broadcast %55 : vector<1x128xf32> to vector<32x128xf32>
    %85 = arith.addf %83, %84 : vector<32x128xf32>
    %cst_43 = arith.constant 0.000000e+00 : f32
    %86 = vector.broadcast %cst_43 : f32 to vector<32x128xf32>
    %87 = arith.maximumf %85, %86 : vector<32x128xf32>
    %88 = arith.addf %87, %51 : vector<32x128xf32>
    %cst_44 = arith.constant 0.000000e+00 : f32
    %89 = vector.broadcast %cst_44 : f32 to vector<32x128xf32>
    %90 = arith.maximumf %88, %89 : vector<32x128xf32>
    %91 = vector.extract_strided_slice %90 {offsets = [16, 0], sizes = [16, 8], strides = [1, 1]} : vector<32x128xf32> to vector<16x8xf32>
    %c0_45 = arith.constant 0 : index
    %c0_46 = arith.constant 0 : index
    %c0_47 = arith.constant 0 : index
    %92 = vector.load %arg13[%c0_45, %c0_46, %c0_47] : memref<1x16x8xf32, #tpu.memory_space<vmem>>, vector<1x16x8xf32>
    %93 = vector.shape_cast %92 : vector<1x16x8xf32> to vector<16x8xf32>
    %94 = vector.shape_cast %91 : vector<16x8xf32> to vector<1x16x8xf32>
    tpu.vector_store %arg13[%c0_45, %c0_46, %c0_47], %94 {strides = array<i32>} : memref<1x16x8xf32, #tpu.memory_space<vmem>>, vector<1x16x8xf32>,
    return
  }
  func.func @transform_0(%arg0: i32, %arg1: i32) -> (i32, i32, i32) {
    %c0_i32 = arith.constant 0 : i32
    %c0_i32_0 = arith.constant 0 : i32
    return %arg0, %arg1, %c0_i32 : i32, i32, i32
  }
  func.func @transform_1(%arg0: i32, %arg1: i32) -> (i32, i32, i32) {
    %c0_i32 = arith.constant 0 : i32
    %c0_i32_0 = arith.constant 0 : i32
    return %arg0, %arg1, %c0_i32 : i32, i32, i32
  }
  func.func @transform_2(%arg0: i32, %arg1: i32) -> (i32, i32) {
    %c0_i32 = arith.constant 0 : i32
    %c0_i32_0 = arith.constant 0 : i32
    %c0_i32_1 = arith.constant 0 : i32
    return %c0_i32, %c0_i32_0 : i32, i32
  }
  func.func @transform_3(%arg0: i32, %arg1: i32) -> (i32, i32) {
    %c0_i32 = arith.constant 0 : i32
    %c0_i32_0 = arith.constant 0 : i32
    %c0_i32_1 = arith.constant 0 : i32
    return %c0_i32, %c0_i32_0 : i32, i32
  }
  func.func @transform_4(%arg0: i32, %arg1: i32) -> (i32, i32) {
    %c0_i32 = arith.constant 0 : i32
    %c0_i32_0 = arith.constant 0 : i32
    %c0_i32_1 = arith.constant 0 : i32
    return %c0_i32, %c0_i32_0 : i32, i32
  }
  func.func @transform_5(%arg0: i32, %arg1: i32) -> (i32, i32) {
    %c0_i32 = arith.constant 0 : i32
    %c0_i32_0 = arith.constant 0 : i32
    %c0_i32_1 = arith.constant 0 : i32
    return %c0_i32, %c0_i32_0 : i32, i32
  }
  func.func @transform_6(%arg0: i32, %arg1: i32) -> (i32, i32) {
    %c0_i32 = arith.constant 0 : i32
    %c0_i32_0 = arith.constant 0 : i32
    %c0_i32_1 = arith.constant 0 : i32
    return %c0_i32, %c0_i32_0 : i32, i32
  }
  func.func @transform_7(%arg0: i32, %arg1: i32) -> (i32, i32) {
    %c0_i32 = arith.constant 0 : i32
    %c0_i32_0 = arith.constant 0 : i32
    %c0_i32_1 = arith.constant 0 : i32
    return %c0_i32, %c0_i32_0 : i32, i32
  }
  func.func @transform_8(%arg0: i32, %arg1: i32) -> (i32, i32) {
    %c0_i32 = arith.constant 0 : i32
    %c0_i32_0 = arith.constant 0 : i32
    %c0_i32_1 = arith.constant 0 : i32
    return %c0_i32, %c0_i32_0 : i32, i32
  }
  func.func @transform_9(%arg0: i32, %arg1: i32) -> (i32, i32) {
    %c0_i32 = arith.constant 0 : i32
    %c0_i32_0 = arith.constant 0 : i32
    %c0_i32_1 = arith.constant 0 : i32
    return %c0_i32, %c0_i32_0 : i32, i32
  }
  func.func @transform_10(%arg0: i32, %arg1: i32) -> (i32, i32) {
    %c0_i32 = arith.constant 0 : i32
    %c0_i32_0 = arith.constant 0 : i32
    %c0_i32_1 = arith.constant 0 : i32
    return %c0_i32, %c0_i32_0 : i32, i32
  }
  func.func @transform_11(%arg0: i32, %arg1: i32) -> (i32, i32, i32) {
    %c0_i32 = arith.constant 0 : i32
    %c0_i32_0 = arith.constant 0 : i32
    return %arg0, %arg1, %c0_i32 : i32, i32, i32
  }
}

</mosaic_0001>

<bundles_post_ra>
// kernel: tpu_custom_call.1
= control target key start
LH: loop header
LB: loop body
LE: loop exit
PB: predicated region body
PF: predicated region fallthrough
CT: control target
= control target key end

     0   :  { %s2085_s0 = inlined_call_operand.vmem [shape: f32[2,16,8], index: 0, kind: input, shape index: {}]   ;;  %s2086_s1 = inlined_call_operand.vmem [shape: f32[2,16,8], index: 1, kind: input, shape index: {}]   ;;  %s2087_s2 = inlined_call_operand.vmem [shape: f32[8,384], index: 2, kind: input, shape index: {}]   ;;  %s2088_s3 = inlined_call_operand.vmem [shape: f32[1,128], index: 3, kind: input, shape index: {}]   ;;  %s2089_s4 = inlined_call_operand.hbm [shape: f32[128,256], index: 4, kind: input, shape index: {}]   ;;  %s2090_s5 = inlined_call_operand.vmem [shape: f32[1,128], index: 5, kind: input, shape index: {}]   ;;  %s2091_s6 = inlined_call_operand.vmem [shape: f32[1,128], index: 6, kind: input, shape index: {}]   ;;  %s2092_s7 = inlined_call_operand.hbm [shape: f32[128,256], index: 7, kind: input, shape index: {}]   ;;  %s2093_s8 = inlined_call_operand.vmem [shape: f32[1,128], index: 8, kind: input, shape index: {}]   ;;  %s2094_s9 = inlined_call_operand.hbm [shape: f32[128,256], index: 9, kind: input, shape index: {}]   ;;  %s2095_s10 = inlined_call_operand.vmem [shape: f32[1,128], index: 10, kind: input, shape index: {}]   ;;  %s2096_s11 = inlined_call_operand.vmem [shape: f32[2,16,8], index: 11, kind: output, shape index: {}]  }
   0x1   :  { %2102 = sst [smem:[#allocation13_spill]] %s2096_s11 }
   0x2   :  { %16 = vsyncpa [#allocation5], 0 }
   0x3   :  { %17 = vsyncpa [#allocation7], 0  ;;  %s1778_s17 = smov 0   ;;  %s1780_s18 = smov 0  }
   0x4   :  { %s1782_s19 = smov 0  }
   0x5 LB: > { %2103 = sst [smem:[#allocation11_spill]] %s1706_s18  ;;  %s1378_s20 = sadd.s32 4294967295, %s1710_s19   ;;  %s1710_s19 = sphi %s1782_s19, %s23_s19   ;;  %s1706_s18 = sphi %s1780_s18, %s2115_s18   ;;  %s1702_s17 = sphi %s1778_s17, %s2114_s17  }
   0x6   : > { %2104 = sst [smem:[#allocation12_spill]] %s1710_s19  ;;  %p1380_p0 = scmp.ge.s32.totalorder %s1710_s19, 1 }
   0x7   : > { %p313_p1 = scmp.lt.s32.totalorder %s1710_s19, 3  ;;  %p1796_p2 = scmp.eq.s32.totalorder %s1378_s20, 0 }
   0x8   : > { %s1712_s23 = smov [#allocation6]   ;;  %s35_s26 = sadd.s32 1, %s1706_s18 }
   0x9   : > { %s2105_s21 = scalar_select %p1796_p2, 1, 0 }
   0xa   : > { %p1800_p3 = pnand %p1380_p0, %p313_p1  ;;  %s350_s24 = sshll.u32 %s1712_s23, 4  ;;  %s1804_s24 = int_to_ptr.vmem [resolvable:$true] %s350_s24 }
   0xb   : > { %p1815_p6 = scmp.ge.s32.totalorder %s35_s26, 2  ;;  %s1713_s28 = smov [#allocation4]  }
   0xc   : > { %s2106_s22 = scalar_select %p1800_p3, 1, 0 }
   0xd   : > { %p1550_p4 = pneg %p1800_p3  ;;  %s331_s29 = sshll.u32 %s1713_s28, 4  ;;  %s332_s29 = int_to_ptr.vmem [resolvable:$true] %s331_s29 }
   0xe   : > { %s1596_s13 = scalar_lea.hbm %s2092_s7, 4096 }
   0xf   : > { %p1810_p5 = pnand %p1796_p2, %p1550_p4  ;;  %p1597_p7 = scmp.ne.s32.totalorder %s2092_s7, %s1596_s13 }
  0x10   : > { %p1603_p11 = scmp.lt.u32.totalorder %s1596_s13, %s2092_s7 }
  0x11   : > { %p1827_p8 = pneg %p1810_p5 }
  0x13   : > { %p1599_p9 = pnand %p1827_p8, %p1597_p7 }
  0x15   : > { %p1600_p10 = pneg %p1599_p9 }
  0x17   : > { %p1605_p12 = pnand %p1603_p11, %p1600_p10 }
  0x19   : > { %1608 = shalt.err (!%p1605_p12)
}
  0x1a   : > { %s1609_s28 = scalar_lea.vmem %s1804_s24, 4096  ;;  %p1617_p4 = scmp.lt.s32.totalorder %s1804_s24, %s1804_s24 }
  0x1b   : > { %p1610_p13 = scmp.ne.s32.totalorder %s1804_s24, %s1609_s28  ;;  %p1618_p2 = scmp.lt.s32.totalorder %s1609_s28, %s1609_s28 }
  0x1d   : > { %p1612_p0 = pnand %p1610_p13, %p1827_p8  ;;  %p1619_p7 = por %p1618_p2, %p1617_p4 }
  0x1f   : > { %p1613_p1 = pneg %p1612_p0 }
  0x21   : > { %p1620_p9 = pnand %p1619_p7, %p1613_p1 }
  0x23   : > { %1623 = shalt.err (!%p1620_p9)
}
  0x24   : > { %s1714_s30 = smov 256   ;;  %s1715_s12 = smov 16  }
  0x25   : > { %1556 = dma.hbm_to_vmem [thread:$0]  (!%p1810_p5), %s2092_s7, 4096, %s1804_s24, [#allocation7], %s1714_s30, %s1714_s30, %s1715_s12  }
  0x26   : > { %s2117_s26 = smov (%p1815_p6, %s35_s26), 0  ;;  %s1624_s23 = scalar_lea.hbm %s2089_s4, 4096 }
  0x27   : > { %p1625_p2 = scmp.ne.s32.totalorder %s2089_s4, %s1624_s23  ;;  %p1631_p12 = scmp.lt.u32.totalorder %s1624_s23, %s2089_s4 }
  0x29   : > { %p1627_p10 = pnand %p1625_p2, %p1827_p8 }
  0x2b   : > { %p1628_p11 = pneg %p1627_p10 }
  0x2d   : > { %p1633_p13 = pnand %p1631_p12, %p1628_p11 }
  0x2f   : > { %1636 = shalt.err (!%p1633_p13)
}
  0x30   : > { %s1637_s24 = scalar_lea.vmem %s332_s29, 4096  ;;  %p1645_p4 = scmp.lt.s32.totalorder %s332_s29, %s332_s29 }
  0x31   : > { %p1638_p6 = scmp.ne.s32.totalorder %s332_s29, %s1637_s24  ;;  %p1646_p7 = scmp.lt.s32.totalorder %s1637_s24, %s1637_s24 }
  0x33   : > { %p1640_p0 = pnand %p1638_p6, %p1827_p8  ;;  %p1647_p9 = por %p1646_p7, %p1645_p4 }
  0x35   : > { %p1641_p1 = pneg %p1640_p0 }
  0x37   : > { %p1648_p3 = pnand %p1647_p9, %p1641_p1 }
  0x39   : > { %1651 = shalt.err (!%p1648_p3)
}
  0x3a   : > { %1553 = dma.hbm_to_vmem [thread:$0]  (!%p1810_p5), %s2089_s4, 4096, %s332_s29, [#allocation5], %s1714_s30, %s1714_s30, %s1715_s12  }
  0x3b   : > { %s1716_s19 = smov [#allocation8]   ;;  %s1652_s15 = scalar_lea.hbm %s2094_s9, 4096 }
  0x3c   : > { %s366_s27 = sshll.u32 %s1716_s19, 4  ;;  %p1653_p3 = scmp.ne.s32.totalorder %s2094_s9, %s1652_s15  ;;  %s367_s27 = int_to_ptr.vmem [resolvable:$true] %s366_s27 }
  0x3d   : > { %p1659_p11 = scmp.lt.u32.totalorder %s1652_s15, %s2094_s9 }
  0x3e   : > { %p1655_p2 = pnand %p1653_p3, %p1827_p8 }
  0x40   : > { %p1656_p10 = pneg %p1655_p2 }
  0x42   : > { %p1661_p12 = pnand %p1659_p11, %p1656_p10 }
  0x44   : > { %1664 = shalt.err (!%p1661_p12)
}
  0x45   : > { %s1665_s29 = scalar_lea.vmem %s367_s27, 4096  ;;  %p1673_p1 = scmp.lt.s32.totalorder %s367_s27, %s367_s27 }
  0x46   : > { %p1666_p13 = scmp.ne.s32.totalorder %s367_s27, %s1665_s29  ;;  %p1674_p4 = scmp.lt.s32.totalorder %s1665_s29, %s1665_s29 }
  0x48   : > { %p1668_p6 = pnand %p1666_p13, %p1827_p8  ;;  %p1675_p7 = por %p1674_p4, %p1673_p1 }
  0x4a   : > { %p1669_p0 = pneg %p1668_p6 }
  0x4c   : > { %p1676_p9 = pnand %p1675_p7, %p1669_p0 }
  0x4e   : > { %1679 = shalt.err (!%p1676_p9)
}
  0x4f   : > { %1559 = dma.hbm_to_vmem [thread:$0]  (!%p1810_p5), %s2094_s9, 4096, %s367_s27, [#allocation7], %s1714_s30, %s1714_s30, %s1715_s12  }
  0x50   : > { %p2110_p3 = scmp.ne.s32.totalorder %s2106_s22, 0 }
  0x51   : > { %p2111_p8 = scmp.ne.s32.totalorder (!%p2110_p3), %s2105_s21, 0 }
  0x52   : > { %411 = sbr.rel (%p2110_p3) target bundleno = 1014 (0x3f6), region = 64 }
  0x59   : > { %1693 = dma.done.wait (%p2111_p8), [#allocation5], 4096  }
  0x5a   : > { %1695 = vsyncadd (%p2111_p8), [#allocation5], 4294963200 }
  0x5b   : > { %1697 = dma.done.wait (%p2111_p8), [#allocation7], 8192  }
  0x5c   : > { %1699 = vsyncadd (%p2111_p8), [#allocation7], 4294959104  ;;  %p477_p2 = scmp.lt.s32.totalorder %s1702_s17, 1  ;;  %v1717_v0 = vmov 0.0   ;;  %vm509_vm0 = vcmask 64512   ;;  %v522_v1 = vld [vmem:[%s2087_s2 + $0x8] sm:$0xff] }
  0x5d   : > { %639 = vmatprep.mubr.f32.mxu0 %v1717_v0  ;;  %v521_v2 = vld [vmem:[%s2087_s2] sm:$0xff]  ;;  %575 = vmatprep.subr.mxu0 %v522_v1  ;;  %v526_v7 = vld [vmem:[#allocation4 + $0x8] sm:$0xff]  ;;  %v528_v8 = vld [vmem:[#allocation4 + $0x18] sm:$0xff]  ;;  %s2112_s27 = sld [smem:[#allocation13_spill]] }
  0x5e   : > { %s2119_s17 = smov (!%p477_p2, %s1702_s17), 1  ;;  %576 = vmatpush1.msra.mxu0 %v521_v2  ;;  %v1426_v9 = vpack.c.bf16 %v528_v8, %v526_v7  ;;  %v525_v10 = vld [vmem:[#allocation4] sm:$0xff]  ;;  %v527_v11 = vld [vmem:[#allocation4 + $0x10] sm:$0xff]  ;;  %v530_v12 = vld [vmem:[#allocation4 + $0x28] sm:$0xff] }
  0x5f   : > { %s1910_s22 = sshll.u32 %s2119_s17, 4  ;;  %v532_v13 = vld [vmem:[#allocation4 + $0x38] sm:$0xff]  ;;  %v1428_v14 = vpack.c.bf16 %v527_v11, %v525_v10  ;;  %v529_v16 = vld [vmem:[#allocation4 + $0x20] sm:$0xff]  ;;  %v531_v17 = vld [vmem:[#allocation4 + $0x30] sm:$0xff] }
  0x60   : > { %s494_s30 = scalar_lea.vmem %s2086_s1, %s1910_s22  ;;  %s484_s21 = scalar_lea.vmem %s2085_s0, %s1910_s22  ;;  %1427 = vmatprep.subr.bf16.mxu0 %v1426_v9  ;;  %v1430_v15 = vpack.c.bf16 %v532_v13, %v530_v12  ;;  %v534_v19 = vld [vmem:[#allocation4 + $0x48] sm:$0xff]  ;;  %v536_v20 = vld [vmem:[#allocation4 + $0x58] sm:$0xff]  ;;  %v1432_v22 = vpack.c.bf16 %v531_v17, %v529_v16  ;;  %v533_v24 = vld [vmem:[#allocation4 + $0x40] sm:$0xff] }
  0x61   : > { %v507_v3 = vld [vmem:[%s494_s30] sm:$0xff]  ;;  %v508_v4 = vld [vmem:[%s494_s30 + $0x8] sm:$0xff]  ;;  %v1434_v23 = vpack.c.bf16 %v536_v20, %v534_v19  ;;  %v535_v25 = vld [vmem:[#allocation4 + $0x50] sm:$0xff] }
  0x62   : > { %510 = vst.msk [vmem:[#allocation2] sm:$0xff] %vm509_vm0, %v507_v3  ;;  %v512_v5 = vld [vmem:[%s484_s21] sm:$0xff]  ;;  %v513_v6 = vld [vmem:[%s484_s21 + $0x8] sm:$0xff]  ;;  %511 = vst.msk [vmem:[#allocation2 + $0x8] sm:$0xff] %vm509_vm0, %v508_v4  ;;  %v1436_v29 = vpack.c.bf16 %v535_v25, %v533_v24 }
  0x63   : > { %514 = vst.msk [vmem:[#allocation2 + $0x10] sm:$0xff] %vm509_vm0, %v512_v5  ;;  %515 = vst.msk [vmem:[#allocation2 + $0x18] sm:$0xff] %vm509_vm0, %v513_v6  ;;  %v538_v26 = vld [vmem:[#allocation4 + $0x68] sm:$0xff]  ;;  %v540_v27 = vld [vmem:[#allocation4 + $0x78] sm:$0xff]  ;;  %s504_s13 = scalar_lea.vmem %s2112_s27, %s1910_s22 }
  0x64   : > { %v1438_v30 = vpack.c.bf16 %v540_v27, %v538_v26  ;;  %v537_v31 = vld [vmem:[#allocation4 + $0x60] sm:$0xff]  ;;  %v539_v32 = vld [vmem:[#allocation4 + $0x70] sm:$0xff]  ;;  %v542_v33 = vld [vmem:[#allocation4 + $0x88] sm:$0xff] }
  0x65   : > { %v544_v34 = vld [vmem:[#allocation4 + $0x98] sm:$0xff]  ;;  %v1440_v36 = vpack.c.bf16 %v539_v32, %v537_v31  ;;  %v541_v38 = vld [vmem:[#allocation4 + $0x80] sm:$0xff]  ;;  %v543_v39 = vld [vmem:[#allocation4 + $0x90] sm:$0xff] }
  0x66   : > { %v1442_v37 = vpack.c.bf16 %v544_v34, %v542_v33  ;;  %v546_v40 = vld [vmem:[#allocation4 + $0xa8] sm:$0xff]  ;;  %v548_v41 = vld [vmem:[#allocation4 + $0xb8] sm:$0xff]  ;;  %v1444_v42 = vpack.c.bf16 %v543_v39, %v541_v38  ;;  %v545_v44 = vld [vmem:[#allocation4 + $0xa0] sm:$0xff]  ;;  %v516_v33 = vlaneseq }
  0x67   : > { %v1446_v43 = vpack.c.bf16 %v548_v41, %v546_v40  ;;  %v547_v45 = vld [vmem:[#allocation4 + $0xb0] sm:$0xff]  ;;  %v550_v46 = vld [vmem:[#allocation4 + $0xc8] sm:$0xff]  ;;  %v552_v47 = vld [vmem:[#allocation4 + $0xd8] sm:$0xff] }
  0x68   : > { %v1448_v48 = vpack.c.bf16 %v547_v45, %v545_v44  ;;  %v1450_v49 = vpack.c.bf16 %v552_v47, %v550_v46  ;;  %v549_v50 = vld [vmem:[#allocation4 + $0xc0] sm:$0xff]  ;;  %v551_v51 = vld [vmem:[#allocation4 + $0xd0] sm:$0xff]  ;;  %v554_v53 = vld [vmem:[#allocation4 + $0xe8] sm:$0xff] }
  0x69   : > { %v559_v18 = vld [vmem:[#allocation2] sm:$0xff]  ;;  %v560_v21 = vld [vmem:[#allocation2 + $0x8] sm:$0xff]  ;;  %v1452_v52 = vpack.c.bf16 %v551_v51, %v549_v50  ;;  %v556_v54 = vld [vmem:[#allocation4 + $0xf8] sm:$0xff] }
  0x6a   : > { %1395 = vmatmul.mubr.msk.f32.vlgmr.msra.gmra.mrb[0].mxu0 %vm509_vm0, %v559_v18  ;;  %1420 = vmatprep.mubr.msk.f32.mxu1 %vm509_vm0, %v559_v18  ;;  %v561_v28 = vld [vmem:[#allocation2 + $0x10] sm:$0xff]  ;;  %v562_v35 = vld [vmem:[#allocation2 + $0x18] sm:$0xff]  ;;  %v1454_v55 = vpack.c.bf16 %v556_v54, %v554_v53  ;;  %v553_v56 = vld [vmem:[#allocation4 + $0xe0] sm:$0xff] }
  0x6b   : > { %645 = vmatprep.mubr.f32.mxu0 %v1717_v0  ;;  %1429 = vmatpush1.bf16.msra.mxu0 %v1428_v14  ;;  %v555_v57 = vld [vmem:[#allocation4 + $0xf0] sm:$0xff]  ;;  %v932_v60 = vld [vmem:[#allocation6 + $0x8] sm:$0xff]  ;;  %v934_v61 = vld [vmem:[#allocation6 + $0x18] sm:$0xff] }
  0x6c   : > { %1431 = vmatprep.subr.bf16.mxu0 %v1430_v15  ;;  %v1456_v58 = vpack.c.bf16 %v555_v57, %v553_v56  ;;  %v523_v59 = vld [vmem:[%s2087_s2 + $0x10] sm:$0xff]  ;;  %v931_v62 = vld [vmem:[#allocation6] sm:$0xff]  ;;  %v1458_v63 = vpack.c.bf16 %v934_v61, %v932_v60  ;;  %v936_v2 = vld [vmem:[#allocation6 + $0x28] sm:$0xff] }
  0x6d   : > { %1418 = vmatprep.subr.mxu1 %v523_v59  ;;  %v933_v1 = vld [vmem:[#allocation6 + $0x10] sm:$0xff]  ;;  %v938_v3 = vld [vmem:[#allocation6 + $0x38] sm:$0xff]  ;;  %v935_v6 = vld [vmem:[#allocation6 + $0x20] sm:$0xff] }
  0x6e   : > { %1396 = vmatmul.mubr.msk.f32.gmra.mrb[2].mxu0 %vm509_vm0, %v560_v21  ;;  %1419 = vmatpush3.msra.mxu1 %v523_v59  ;;  %v1460_v4 = vpack.c.bf16 %v933_v1, %v931_v62  ;;  %v1462_v5 = vpack.c.bf16 %v938_v3, %v936_v2  ;;  %v937_v7 = vld [vmem:[#allocation6 + $0x30] sm:$0xff]  ;;  %v940_v8 = vld [vmem:[#allocation6 + $0x48] sm:$0xff]  ;;  %v942_v9 = vld [vmem:[#allocation6 + $0x58] sm:$0xff] }
  0x6f   : > { %651 = vmatprep.mubr.f32.mxu0 %v1717_v0  ;;  %1433 = vmatpush1.bf16.msra.mxu0 %v1432_v22  ;;  %v1464_v10 = vpack.c.bf16 %v937_v7, %v935_v6  ;;  %v1466_v11 = vpack.c.bf16 %v942_v9, %v940_v8  ;;  %v939_v12 = vld [vmem:[#allocation6 + $0x40] sm:$0xff]  ;;  %v941_v13 = vld [vmem:[#allocation6 + $0x50] sm:$0xff]  ;;  %v944_v14 = vld [vmem:[#allocation6 + $0x68] sm:$0xff] }
  0x70   : > { %1435 = vmatprep.subr.bf16.mxu0 %v1434_v23  ;;  %1421 = vmatmul.mubr.msk.f32.vlgmr.msra.gmra.mrb[0].mxu1 %vm509_vm0, %v560_v21  ;;  %v946_v15 = vld [vmem:[#allocation6 + $0x78] sm:$0xff]  ;;  %v1468_v16 = vpack.c.bf16 %v941_v13, %v939_v12  ;;  %v943_v18 = vld [vmem:[#allocation6 + $0x60] sm:$0xff]  ;;  %v945_v19 = vld [vmem:[#allocation6 + $0x70] sm:$0xff] }
  0x71   : > { %1423 = vmatprep.mubr.msk.f32.mxu1 %vm509_vm0, %v561_v28  ;;  %1459 = vmatprep.subr.bf16.mxu1 %v1458_v63  ;;  %v1470_v17 = vpack.c.bf16 %v946_v15, %v944_v14  ;;  %v948_v20 = vld [vmem:[#allocation6 + $0x88] sm:$0xff]  ;;  %v950_v21 = vld [vmem:[#allocation6 + $0x98] sm:$0xff]  ;;  %v1472_v22 = vpack.c.bf16 %v945_v19, %v943_v18  ;;  %v947_v24 = vld [vmem:[#allocation6 + $0x80] sm:$0xff] }
  0x72   : > { %1397 = vmatmul.mubr.msk.f32.gmra.mrb[4].mxu0 %vm509_vm0, %v561_v28  ;;  %1461 = vmatpush1.bf16.msra.mxu1 %v1460_v4  ;;  %v1474_v23 = vpack.c.bf16 %v950_v21, %v948_v20  ;;  %v949_v25 = vld [vmem:[#allocation6 + $0x90] sm:$0xff]  ;;  %v952_v26 = vld [vmem:[#allocation6 + $0xa8] sm:$0xff]  ;;  %v954_v27 = vld [vmem:[#allocation6 + $0xb8] sm:$0xff] }
  0x73   : > { %657 = vmatprep.mubr.f32.mxu0 %v1717_v0  ;;  %1437 = vmatpush1.bf16.msra.mxu0 %v1436_v29  ;;  %v1476_v28 = vpack.c.bf16 %v949_v25, %v947_v24  ;;  %v1478_v29 = vpack.c.bf16 %v954_v27, %v952_v26  ;;  %v953_v31 = vld [vmem:[#allocation6 + $0xb0] sm:$0xff]  ;;  %v1403_v34 = vld [vmem:[%s2088_s3] ss:$0 sm:$0xff]  ;;  %v956_v61 = vld [vmem:[#allocation6 + $0xc8] sm:$0xff] }
  0x74   : > { %1439 = vmatprep.subr.bf16.mxu0 %v1438_v30  ;;  %1424 = vmatmul.mubr.msk.f32.gmra.mrb[2].mxu1 %vm509_vm0, %v562_v35  ;;  %v951_v30 = vld [vmem:[#allocation6 + $0xa0] sm:$0xff]  ;;  %v958_v62 = vld [vmem:[#allocation6 + $0xd8] sm:$0xff]  ;;  %v957_v2 = vld [vmem:[#allocation6 + $0xd0] sm:$0xff] }
  0x75   : > { %1061 = vmatprep.mubr.f32.mxu1 %v1717_v0  ;;  %1463 = vmatprep.subr.bf16.mxu1 %v1462_v5  ;;  %v1480_v32 = vpack.c.bf16 %v953_v31, %v951_v30  ;;  %v1482_v63 = vpack.c.bf16 %v958_v62, %v956_v61  ;;  %v955_v1 = vld [vmem:[#allocation6 + $0xc0] sm:$0xff]  ;;  %v960_v6 = vld [vmem:[#allocation6 + $0xe8] sm:$0xff]  ;;  %v962_v7 = vld [vmem:[#allocation6 + $0xf8] sm:$0xff] }
  0x76   : > { %1398 = vmatmul.mubr.msk.f32.gmra.mrb[6].mxu0 %vm509_vm0, %v562_v35  ;;  %1465 = vmatpush1.bf16.msra.mxu1 %v1464_v10  ;;  %v1484_v3 = vpack.c.bf16 %v957_v2, %v955_v1  ;;  %v1486_v8 = vpack.c.bf16 %v962_v7, %v960_v6  ;;  %v959_v9 = vld [vmem:[#allocation6 + $0xe0] sm:$0xff]  ;;  %v961_v10 = vld [vmem:[#allocation6 + $0xf0] sm:$0xff]  ;;  %v965_v14 = vld [vmem:[#allocation8 + $0x8] sm:$0xff] }
  0x77   : > { %1441 = vmatpush1.bf16.msra.mxu0 %v1440_v36  ;;  %858 = vmatprep.mubr.f32.mxu0 %v1717_v0  ;;  %v967_v15 = vld [vmem:[#allocation8 + $0x18] sm:$0xff]  ;;  %v966_v18 = vld [vmem:[#allocation8 + $0x10] sm:$0xff]  ;;  %v969_v19 = vld [vmem:[#allocation8 + $0x28] sm:$0xff] }
  0x78   : > { %1443 = vmatprep.subr.bf16.mxu0 %v1442_v37  ;;  %1467 = vmatprep.subr.bf16.mxu1 %v1466_v11  ;;  %v1949_v37 = vshrl.u32 %v516_v33, 7  ;;  %v1488_v11 = vpack.c.bf16 %v961_v10, %v959_v9  ;;  %v971_v20 = vld [vmem:[#allocation8 + $0x38] sm:$0xff]  ;;  %v970_v24 = vld [vmem:[#allocation8 + $0x30] sm:$0xff]  ;;  %v973_v25 = vld [vmem:[#allocation8 + $0x48] sm:$0xff] }
  0x79   : > { %v975_v26 = vld [vmem:[#allocation8 + $0x58] sm:$0xff]  ;;  %v974_v30 = vld [vmem:[#allocation8 + $0x50] sm:$0xff]  ;;  %v977_v31 = vld [vmem:[#allocation8 + $0x68] sm:$0xff] }
  0x7a   : > { %1469 = vmatpush1.bf16.msra.mxu1 %v1468_v16  ;;  %vm753_vm1 = vcmp.lt.s32.totalorder %v1949_v37, 1  ;;  %v964_v16 = vld [vmem:[#allocation8] sm:$0xff]  ;;  %vm1090_vm3 = vcmp.lt.s32.totalorder %v1949_v37, 2 }
  0x7b   : > { %1445 = vmatpush1.bf16.msra.mxu0 %v1444_v42  ;;  %1471 = vmatprep.subr.bf16.mxu1 %v1470_v17  ;;  %v1952_v42 = vadd.s32 16, %v1949_v37  ;;  %v1490_v17 = vpack.c.bf16 %v967_v15, %v965_v14  ;;  %v1974_v21 = vpack.c.bf16 %v966_v18, %v964_v16 }
  0x7c   : > { %1447 = vmatprep.subr.bf16.mxu0 %v1446_v43 }
  0x7d   : > { %vm762_vm2 = vcmp.ge.s32.totalorder %v1952_v42, 17  ;;  %vm1099_vm4 = vcmp.ge.s32.totalorder %v1952_v42, 18 }
  0x7e   : > { %1473 = vmatpush1.bf16.msra.mxu1 %v1472_v22  ;;  %v1976_v22 = vpack.c.bf16 %v971_v20, %v969_v19 }
  0x7f   : > { %1449 = vmatpush1.bf16.msra.mxu0 %v1448_v48  ;;  %1475 = vmatprep.subr.bf16.mxu1 %v1474_v23  ;;  %v968_v23 = vld [vmem:[#allocation8 + $0x20] sm:$0xff] }
  0x80   : > { %1451 = vmatprep.subr.bf16.mxu0 %v1450_v49  ;;  %v1979_v27 = vpack.c.bf16 %v970_v24, %v968_v23 }
  0x82   : > { %1477 = vmatpush1.bf16.msra.mxu1 %v1476_v28  ;;  %v1982_v28 = vpack.c.bf16 %v975_v26, %v973_v25 }
  0x83   : > { %1453 = vmatpush1.bf16.msra.mxu0 %v1452_v52  ;;  %1479 = vmatprep.subr.bf16.mxu1 %v1478_v29  ;;  %v972_v29 = vld [vmem:[#allocation8 + $0x40] sm:$0xff] }
  0x84   : > { %1455 = vmatprep.subr.bf16.mxu0 %v1454_v55  ;;  %v1985_v33 = vpack.c.bf16 %v974_v30, %v972_v29 }
  0x86   : > { %1481 = vmatpush1.bf16.msra.mxu1 %v1480_v32  ;;  %v979_v32 = vld [vmem:[#allocation8 + $0x78] sm:$0xff] }
  0x87   : > { %1457 = vmatpush1.bf16.msra.mxu0 %v1456_v58  ;;  %1483 = vmatprep.subr.bf16.mxu1 %v1482_v63 }
  0x88   : > { %1491 = vmatprep.subr.bf16.mxu0 %v1490_v17 }
  0x8a   : > { %1485 = vmatpush1.bf16.msra.mxu1 %v1484_v3 }
  0x8b   : > { %1487 = vmatprep.subr.bf16.mxu1 %v1486_v8 }
  0x8e   : > { %1489 = vmatpush1.bf16.msra.mxu1 %v1488_v11 }
  0x8f   : > { %1522 = vmatprep.subr.bf16.mxu1 %v1490_v17 }
 0x13d   : > { %v641_v35 = vpop.f32.mrb[0].mxu0 }
 0x13e   : > { %v643_v36 = vpop.f32.mrb[1].mxu0  ;;  %v976_v35 = vld [vmem:[#allocation8 + $0x60] sm:$0xff] }
 0x13f   : > { %v786_v38 = vadd.f32 %v1403_v34, %v643_v36  ;;  %v978_v36 = vld [vmem:[#allocation8 + $0x70] sm:$0xff] }
 0x141   : > { %v790_v39 = vmax.f32 %v786_v38, 0.0  ;;  %v647_v40 = vpop.f32.mrb[2].mxu0  ;;  %v981_v38 = vld [vmem:[#allocation8 + $0x88] sm:$0xff] }
 0x142   : > { %v649_v41 = vpop.f32.mrb[3].mxu0  ;;  %v750_v46 = vrot.slane %v647_v40, 7  ;;  %v1991_v40 = vpack.c.bf16 %v978_v36, %v976_v35  ;;  %v992_v36 = vld [vmem:[#allocation8 + $0xe0] sm:$0xff] }
 0x143   : > { %v787_v43 = vadd.f32 %v1403_v34, %v649_v41  ;;  %859 = vmatmul.mubr.f32.vlgmr.msra.gmra.mrb[8].mxu0 %v790_v39  ;;  %v1966_v4 = vpop.f32.mrb[0].mxu1  ;;  %v983_v39 = vld [vmem:[#allocation8 + $0x98] sm:$0xff] }
 0x144   : > { %864 = vmatprep.mubr.f32.mxu0 %v1717_v0  ;;  %v1968_v5 = vpop.f32.mrb[1].mxu1  ;;  %1493 = vmatpush1.bf16.msra.mxu0 %v1974_v21  ;;  %v1994_v41 = vpack.c.bf16 %v983_v39, %v981_v38  ;;  %v994_v38 = vld [vmem:[#allocation8 + $0xf0] sm:$0xff] }
 0x145   : > { %v791_v44 = vmax.f32 %v787_v43, 0.0  ;;  %v653_v45 = vpop.f32.mrb[4].mxu0  ;;  %1495 = vmatprep.subr.bf16.mxu0 %v1976_v22  ;;  %v980_v43 = vld [vmem:[#allocation8 + $0x80] sm:$0xff]  ;;  %v1520_v39 = vpack.c.bf16 %v994_v38, %v992_v36 }
 0x146   : > { %v751_v47 = vrot.slane %v653_v45, 7  ;;  %v655_v48 = vpop.f32.mrb[5].mxu0  ;;  %v985_v45 = vld [vmem:[#allocation8 + $0xa8] sm:$0xff] }
 0x147   : > { %865 = vmatmul.mubr.f32.gmra.mrb[10].mxu0 %v791_v44  ;;  %v1970_v12 = vpop.f32.mrb[2].mxu1  ;;  %v982_v44 = vld [vmem:[#allocation8 + $0x90] sm:$0xff] }
 0x148   : > { %v755_v49 = vsel %vm753_vm1, %v750_v46, %v751_v47  ;;  %870 = vmatprep.mubr.f32.mxu0 %v1717_v0  ;;  %v1972_v13 = vpop.f32.mrb[3].mxu1  ;;  %1497 = vmatpush1.bf16.msra.mxu0 %v1979_v27  ;;  %v987_v46 = vld [vmem:[#allocation8 + $0xb8] sm:$0xff] }
 0x149   : > { %v774_v50 = vsel %vm762_vm2, %v755_v49, 0.0  ;;  %v659_v51 = vpop.f32.mrb[6].mxu0  ;;  %1499 = vmatprep.subr.bf16.mxu0 %v1982_v28  ;;  %v984_v49 = vld [vmem:[#allocation8 + $0xa0] sm:$0xff] }
 0x14a   : > { %v778_v52 = vadd.f32 %v774_v50, %v655_v48  ;;  %v752_v53 = vrot.slane %v659_v51, 7  ;;  %v661_v54 = vpop.f32.mrb[7].mxu0  ;;  %v2000_v48 = vpack.c.bf16 %v987_v46, %v985_v45  ;;  %v986_v50 = vld [vmem:[#allocation8 + $0xb0] sm:$0xff]  ;;  %v989_v51 = vld [vmem:[#allocation8 + $0xc8] sm:$0xff] }
 0x14c   : > { %v788_v55 = vadd.f32 %v1403_v34, %v778_v52  ;;  %v754_v56 = vsel %vm753_vm1, %v751_v47, %v752_v53  ;;  %1501 = vmatpush1.bf16.msra.mxu0 %v1985_v33  ;;  %v1997_v47 = vpack.c.bf16 %v982_v44, %v980_v43  ;;  %v991_v52 = vld [vmem:[#allocation8 + $0xd8] sm:$0xff]  ;;  %v1512_v53 = vpack.c.bf16 %v986_v50, %v984_v49 }
 0x14d   : > { %v779_v57 = vadd.f32 %v754_v56, %v661_v54  ;;  %v1514_v54 = vpack.c.bf16 %v991_v52, %v989_v51  ;;  %v990_v56 = vld [vmem:[#allocation8 + $0xd0] sm:$0xff] }
 0x14e   : > { %v792_v58 = vmax.f32 %v788_v55, 0.0  ;;  %v988_v55 = vld [vmem:[#allocation8 + $0xc0] sm:$0xff] }
 0x14f   : > { %v789_v59 = vadd.f32 %v1403_v34, %v779_v57  ;;  %v1988_v34 = vpack.c.bf16 %v979_v32, %v977_v31  ;;  %v1516_v57 = vpack.c.bf16 %v990_v56, %v988_v55 }
 0x150   : > { %871 = vmatmul.mubr.f32.gmra.mrb[12].mxu0 %v792_v58  ;;  %v1404_v58 = vld [vmem:[%s2090_s5] ss:$0 sm:$0xff] }
 0x151   : > { %v793_v60 = vmax.f32 %v789_v59, 0.0  ;;  %876 = vmatprep.mubr.f32.mxu0 %v1717_v0  ;;  %1503 = vmatprep.subr.bf16.mxu0 %v1988_v34  ;;  %v1405_v59 = vld [vmem:[%s2091_s6] ss:$0 sm:$0xff] }
 0x152   : > { %1505 = vmatpush1.bf16.msra.mxu0 %v1991_v40  ;;  %v919_v63 = vadd.f32 %v1405_v59, %v1968_v5  ;;  %v920_v6 = vadd.f32 %v1966_v4, %v1405_v59  ;;  %v921_v25 = vadd.f32 %v1405_v59, %v1972_v13  ;;  %v922_v31 = vadd.f32 %v1970_v12, %v1405_v59  ;;  %v993_v12 = vld [vmem:[#allocation8 + $0xe8] sm:$0xff] }
 0x153   : > { %1507 = vmatprep.subr.bf16.mxu0 %v1994_v41 }
 0x154   : > { %877 = vmatmul.mubr.f32.gmra.mrb[14].mxu0 %v793_v60 }
 0x155   : > { %1195 = vmatprep.mubr.f32.mxu0 %v1717_v0 }
 0x156   : > { %1509 = vmatpush1.bf16.msra.mxu0 %v1997_v47 }
 0x157   : > { %1511 = vmatprep.subr.bf16.mxu0 %v2000_v48 }
 0x15a   : > { %1513 = vmatpush1.bf16.msra.mxu0 %v1512_v53 }
 0x15b   : > { %1515 = vmatprep.subr.bf16.mxu0 %v1514_v54 }
 0x15e   : > { %1517 = vmatpush1.bf16.msra.mxu0 %v1516_v57 }
 0x216   : > { %v860_v60 = vpop.f32.mrb[8].mxu0 }
 0x217   : > { %v862_v61 = vpop.f32.mrb[9].mxu0 }
 0x218   : > { %v905_v62 = vadd.f32 %v1404_v58, %v862_v61 }
 0x21a   : > { %v909_v1 = vmax.f32 %v905_v62, 0.0  ;;  %v866_v2 = vpop.f32.mrb[10].mxu0 }
 0x21b   : > { %v868_v3 = vpop.f32.mrb[11].mxu0  ;;  %v884_v5 = vrot.slane %v866_v2, 7 }
 0x21c   : > { %v923_v7 = vadd.f32 %v919_v63, %v909_v1  ;;  %v906_v8 = vadd.f32 %v1404_v58, %v868_v3 }
 0x21e   : > { %v927_v9 = vmax.f32 %v923_v7, 0.0  ;;  %v910_v10 = vmax.f32 %v906_v8, 0.0 }
 0x220   : > { %v924_v11 = vadd.f32 %v920_v6, %v910_v10  ;;  %1062 = vmatmul.mubr.f32.vlgmr.msra.gmra.mrb[4].mxu1 %v927_v9 }
 0x221   : > { %1067 = vmatprep.mubr.f32.mxu1 %v1717_v0  ;;  %1530 = vmatpush1.bf16.msra.mxu1 %v1974_v21 }
 0x222   : > { %v928_v14 = vmax.f32 %v924_v11, 0.0  ;;  %1523 = vmatprep.subr.bf16.mxu1 %v1976_v22 }
 0x223   : > { %v872_v15 = vpop.f32.mrb[12].mxu0 }
 0x224   : > { %v885_v16 = vrot.slane %v872_v15, 7  ;;  %v874_v17 = vpop.f32.mrb[13].mxu0  ;;  %1068 = vmatmul.mubr.f32.gmra.mrb[6].mxu1 %v928_v14 }
 0x225   : > { %1073 = vmatprep.mubr.f32.mxu1 %v1717_v0  ;;  %1531 = vmatpush1.bf16.msra.mxu1 %v1979_v27 }
 0x226   : > { %v888_v4 = vsel %vm753_vm1, %v884_v5, %v885_v16  ;;  %1524 = vmatprep.subr.bf16.mxu1 %v1982_v28  ;;  %v1407_v5 = vld [vmem:[%s2095_s10] ss:$0 sm:$0xff] }
 0x227   : > { %v893_v18 = vsel %vm762_vm2, %v888_v4, 0.0  ;;  %v878_v19 = vpop.f32.mrb[14].mxu0 }
 0x228   : > { %v897_v20 = vadd.f32 %v893_v18, %v874_v17  ;;  %v886_v21 = vrot.slane %v878_v19, 7  ;;  %v880_v22 = vpop.f32.mrb[15].mxu0 }
 0x229   : > { %1532 = vmatpush1.bf16.msra.mxu1 %v1985_v33 }
 0x22a   : > { %v907_v23 = vadd.f32 %v1404_v58, %v897_v20  ;;  %v887_v24 = vsel %vm753_vm1, %v885_v16, %v886_v21  ;;  %1525 = vmatprep.subr.bf16.mxu1 %v1988_v34  ;;  %v995_v34 = vld [vmem:[#allocation8 + $0xf8] sm:$0xff] }
 0x22b   : > { %v898_v26 = vadd.f32 %v887_v24, %v880_v22  ;;  %v1518_v35 = vpack.c.bf16 %v995_v34, %v993_v12 }
 0x22c   : > { %v911_v27 = vmax.f32 %v907_v23, 0.0 }
 0x22d   : > { %v908_v28 = vadd.f32 %v1404_v58, %v898_v26  ;;  %1533 = vmatpush1.bf16.msra.mxu1 %v1991_v40  ;;  %1519 = vmatprep.subr.bf16.mxu0 %v1518_v35  ;;  %v1406_v40 = vld [vmem:[%s2093_s8] ss:$0 sm:$0xff] }
 0x22e   : > { %v2028_v29 = vadd.f32 %v921_v25, %v911_v27  ;;  %1526 = vmatprep.subr.bf16.mxu1 %v1994_v41  ;;  %1521 = vmatpush1.bf16.msra.mxu0 %v1520_v39 }
 0x22f   : > { %v912_v30 = vmax.f32 %v908_v28, 0.0 }
 0x230   : > { %v929_v32 = vmax.f32 %v2028_v29, 0.0 }
 0x231   : > { %v2033_v33 = vadd.f32 %v922_v31, %v912_v30  ;;  %1534 = vmatpush1.bf16.msra.mxu1 %v1997_v47 }
 0x232   : > { %1074 = vmatmul.mubr.f32.gmra.mrb[8].mxu1 %v929_v32  ;;  %1527 = vmatprep.subr.bf16.mxu1 %v2000_v48 }
 0x233   : > { %v930_v13 = vmax.f32 %v2033_v33, 0.0  ;;  %1079 = vmatprep.mubr.f32.mxu1 %v1717_v0 }
 0x235   : > { %1535 = vmatpush1.bf16.msra.mxu1 %v1512_v53 }
 0x236   : > { %1080 = vmatmul.mubr.f32.gmra.mrb[10].mxu1 %v930_v13  ;;  %1528 = vmatprep.subr.bf16.mxu1 %v1514_v54 }
 0x237   : > { %1204 = vmatprep.mubr.f32.mxu1 %v1717_v0 }
 0x239   : > { %1536 = vmatpush1.bf16.msra.mxu1 %v1516_v57 }
 0x23a   : > { %1529 = vmatprep.subr.bf16.mxu1 %v1518_v35 }
 0x23d   : > { %1537 = vmatpush1.bf16.msra.mxu1 %v1520_v39 }
 0x2f3   : > { %v1063_v41 = vpop.f32.mrb[4].mxu1 }
 0x2f4   : > { %v1065_v43 = vpop.f32.mrb[5].mxu1 }
 0x2f5   : > { %v1123_v44 = vadd.f32 %v1406_v40, %v1065_v43 }
 0x2f7   : > { %v1127_v45 = vmax.f32 %v1123_v44, 0.0  ;;  %v1069_v46 = vpop.f32.mrb[6].mxu1 }
 0x2f8   : > { %v1071_v47 = vpop.f32.mrb[7].mxu1  ;;  %v1087_v51 = vrot.slane %v1069_v46, 6 }
 0x2f9   : > { %v1124_v48 = vadd.f32 %v1406_v40, %v1071_v47  ;;  %1196 = vmatmul.mubr.f32.vlgmr.msra.gmra.mrb[16].mxu0 %v1127_v45 }
 0x2fa   : > { %1199 = vmatprep.mubr.f32.mxu0 %v1717_v0 }
 0x2fb   : > { %v1128_v49 = vmax.f32 %v1124_v48, 0.0 }
 0x2fd   : > { %1200 = vmatmul.mubr.f32.gmra.mrb[18].mxu0 %v1128_v49 }
 0x305   : > { %v1075_v50 = vpop.f32.mrb[8].mxu1 }
 0x306   : > { %v1088_v52 = vrot.slane %v1075_v50, 6  ;;  %v1077_v53 = vpop.f32.mrb[9].mxu1 }
 0x308   : > { %v1092_v54 = vsel %vm1090_vm3, %v1087_v51, %v1088_v52 }
 0x309   : > { %v1111_v55 = vsel %vm1099_vm4, %v1092_v54, 0.0  ;;  %v1081_v56 = vpop.f32.mrb[10].mxu1 }
 0x30a   : > { %v1115_v57 = vadd.f32 %v1111_v55, %v1077_v53  ;;  %v1089_v58 = vrot.slane %v1081_v56, 6  ;;  %v1083_v59 = vpop.f32.mrb[11].mxu1 }
 0x30c   : > { %v1125_v60 = vadd.f32 %v1406_v40, %v1115_v57  ;;  %v1091_v61 = vsel %vm1090_vm3, %v1088_v52, %v1089_v58 }
 0x30d   : > { %v1116_v62 = vadd.f32 %v1091_v61, %v1083_v59 }
 0x30e   : > { %v1129_v63 = vmax.f32 %v1125_v60, 0.0 }
 0x30f   : > { %v1126_v1 = vadd.f32 %v1406_v40, %v1116_v62 }
 0x310   : > { %1205 = vmatmul.mubr.f32.vlgmr.msra.gmra.mrb[12].mxu1 %v1129_v63 }
 0x311   : > { %v1130_v2 = vmax.f32 %v1126_v1, 0.0  ;;  %1210 = vmatprep.mubr.f32.mxu1 %v1717_v0 }
 0x314   : > { %1211 = vmatmul.mubr.f32.gmra.mrb[14].mxu1 %v1130_v2 }
 0x3cc   : > { %v1197_v3 = vpop.f32.mrb[16].mxu0 }
 0x3cd   : > { %v1198_v6 = vpop.f32.mrb[17].mxu0 }
 0x3d0   : > { %v1201_v7 = vpop.f32.mrb[18].mxu0 }
 0x3d1   : > { %v1203_v8 = vpop.f32.mrb[19].mxu0  ;;  %v1217_v10 = vrot.slane %v1201_v7, 6 }
 0x3e3   : > { %v1206_v9 = vpop.f32.mrb[12].mxu1 }
 0x3e4   : > { %v1218_v11 = vrot.slane %v1206_v9, 6  ;;  %v1208_v14 = vpop.f32.mrb[13].mxu1 }
 0x3e6   : > { %v1221_v15 = vsel %vm1090_vm3, %v1217_v10, %v1218_v11 }
 0x3e7   : > { %v1222_v0 = vsel %vm1099_vm4, %v1221_v15, 0.0  ;;  %v1212_v16 = vpop.f32.mrb[14].mxu1 }
 0x3e8   : > { %v1224_v17 = vadd.f32 %v1222_v0, %v1208_v14  ;;  %v1219_v4 = vrot.slane %v1212_v16, 6  ;;  %v1214_v18 = vpop.f32.mrb[15].mxu1 }
 0x3ea   : > { %v1232_v19 = vadd.f32 %v1407_v5, %v1224_v17  ;;  %v1220_v20 = vsel %vm1090_vm3, %v1218_v11, %v1219_v4 }
 0x3eb   : > { %v1225_v21 = vadd.f32 %v1220_v20, %v1214_v18 }
 0x3ec   : > { %v1234_v22 = vmax.f32 %v1232_v19, 0.0 }
 0x3ed   : > { %v1233_v23 = vadd.f32 %v1407_v5, %v1225_v21 }
 0x3ee   : > { %v1236_v24 = vadd.f32 %v1234_v22, %v929_v32 }
 0x3ef   : > { %v1235_v42 = vmax.f32 %v1233_v23, 0.0 }
 0x3f0   : > { %v1238_v25 = vmax.f32 %v1236_v24, 0.0 }
 0x3f1   : > { %v1237_v26 = vadd.f32 %v1235_v42, %v930_v13 }
 0x3f2   : > { %1240 = vst.msk [vmem:[%s504_s13] sm:$0xff] %vm509_vm0, %v1238_v25 }
 0x3f3   : > { %v1239_v27 = vmax.f32 %v1237_v26, 0.0 }
 0x3f5   : > { %1241 = vst.msk [vmem:[%s504_s13 + $0x8] sm:$0xff] %vm509_vm0, %v1239_v27 }
 0x3f6 PF: > { %s2113_s14 = sld [smem:[#allocation12_spill]]  ;;  %s2114_s17 = sld [smem:[#allocation11_spill]] }
 0x3f7   : > { %s2115_s18 = smov %s2117_s26 }
 0x3fc   : > { %s23_s19 = sadd.s32 1, %s2113_s14  }
 0x3fd   : > { %p20_p5 = scmp.ge.s32.totalorder %s23_s19, 4  }
 0x3ff   :  { %22 = sbr.rel (!%p20_p5) target bundleno = 5 (0x5), region = 110 }
 0x406   :  { %1272 = vsyncpa [#allocation5], 1 }
 0x407   :  { %1274 = vsyncpa [#allocation5 + $0x1], 1 }
 0x408   :  { %1275 = vsyncpa [#allocation7], 1 }

</bundles_post_ra>
